<compile_context>
chip_gen: v5e
topology: v5e:2x2
jax: 0.10.0
libtpu: 0.0.40
codegen_flags: <defaults>
</compile_context>

<pallas_src>
import jax
import jax.numpy as jnp
from jax import lax
from jax.experimental import pallas as pl
from jax.experimental.pallas import tpu as pltpu


def _round_up(n: int, m: int) -> int:
    return ((n + m - 1) // m) * m


def _default_num_splits() -> int:
    """Token-stream splits: 2 only pays off on chips with 2 TensorCores (v7x)."""
    try:
        info = pltpu.get_tpu_info()
        for attr in ("num_tensorcores", "tensorcores_per_chip", "num_cores",
                     "core_count"):
            n = getattr(info, attr, None)
            if n is not None:
                return 2 if int(n) >= 2 else 1
    except Exception:
        pass
    return 1


def _cos_l2_from_gram(gfull, E: int, C: int):
    """(C, C) f32 packed Gram -> ((E, E) cosine, (E, E) L2). Runs once per call."""
    group = C // E
    if group > 1:
        # Fold the `group` diagonal (E, E) blocks of the packed Gram:
        #   G[i, j] = sum_g gfull[g*E + i, g*E + j].
        # Cross-token (off-diagonal) blocks are masked out, then the fold is two
        # tiny MXU matmuls with 0/1 selection matrices (robust lowering: no
        # sub-lane slicing or in-kernel reshapes required).
        rows = lax.broadcasted_iota(jnp.int32, (C, C), 0)
        cols = lax.broadcasted_iota(jnp.int32, (C, C), 1)
        gd = jnp.where((rows // E) == (cols // E), gfull, 0.0)
        one = jnp.float32(1.0)
        zero = jnp.float32(0.0)
        sel = jnp.where(lax.broadcasted_iota(jnp.int32, (C, E), 0) % E
                        == lax.broadcasted_iota(jnp.int32, (C, E), 1), one, zero)
        sel_t = jnp.where(lax.broadcasted_iota(jnp.int32, (E, C), 1) % E
                          == lax.broadcasted_iota(jnp.int32, (E, C), 0), one, zero)
        g = jnp.dot(jnp.dot(sel_t, gd, preferred_element_type=jnp.float32),
                    sel, preferred_element_type=jnp.float32)
    else:
        g = gfull
    eye = (lax.broadcasted_iota(jnp.int32, (E, E), 0)
           == lax.broadcasted_iota(jnp.int32, (E, E), 1))
    gdiag = jnp.where(eye, g, 0.0)
    diag_col = jnp.sum(gdiag, axis=1, keepdims=True)   # (E, 1) = G_ii
    diag_row = jnp.sum(gdiag, axis=0, keepdims=True)   # (1, E) = G_jj
    denom = jnp.maximum(jnp.sqrt(jnp.maximum(diag_col, 0.0))
                        * jnp.sqrt(jnp.maximum(diag_row, 0.0)), 1e-8)
    cos = g / denom
    l2 = jnp.sqrt(jnp.maximum(diag_col + diag_row - 2.0 * g, 0.0))
    return cos, l2


def _make_fused_kernel(E: int, C: int, total_rows: int, tile_rows: int):
    """Gram accumulation fused with the cosine/L2 finalize (splits == 1)."""
    rem = total_rows % tile_rows

    def kernel(x_ref, cos_ref, l2_ref, acc_ref):
        t = pl.program_id(0)
        nt = pl.num_programs(0)

        @pl.when(t == 0)
        def _():
            acc_ref[...] = jnp.zeros_like(acc_ref)

        x = x_ref[...]
        if rem:
            # Last block is partial: rows >= `rem` hold unspecified (OOB) data.
            valid = jnp.where(t == nt - 1, rem, tile_rows)
            rid = lax.broadcasted_iota(jnp.int32, x.shape, 0)
            x = jnp.where(rid < valid, x, jnp.zeros_like(x))
        # Contract the token/sublane axis directly (no in-kernel transpose);
        # inputs stream in their native dtype, accumulation stays float32.
        acc_ref[...] += lax.dot_general(
            x, x, dimension_numbers=(((0,), (0,)), ((), ())),
            preferred_element_type=jnp.float32)

        @pl.when(t == nt - 1)
        def _():
            cos, l2 = _cos_l2_from_gram(acc_ref[...], E, C)
            cos_ref[...] = cos
            l2_ref[...] = l2

    return kernel


def _make_partial_gram_kernel(rows_per_split: int, tile_rows: int):
    """Per-split partial Gram (splits > 1, leading parallel axis)."""
    rem = rows_per_split % tile_rows

    def kernel(x_ref, gram_ref):
        t = pl.program_id(1)

        @pl.when(t == 0)
        def _():
            gram_ref[...] = jnp.zeros_like(gram_ref)

        x = x_ref[...]
        if rem:
            valid = jnp.where(t == pl.num_programs(1) - 1, rem, tile_rows)
            rid = lax.broadcasted_iota(jnp.int32, x.shape, 0)
            x = jnp.where(rid < valid, x, jnp.zeros_like(x))
        gram_ref[...] += lax.dot_general(
            x, x, dimension_numbers=(((0,), (0,)), ((), ())),
            preferred_element_type=jnp.float32)

    return kernel


def _make_finalize_kernel(E: int, C: int):
    def kernel(gram_ref, cos_ref, l2_ref):
        cos, l2 = _cos_l2_from_gram(jnp.sum(gram_ref[...], axis=0), E, C)
        cos_ref[...] = cos
        l2_ref[...] = l2

    return kernel


def router_logits_similarity(router_logits: jax.Array, *, tile_rows: int = 4096,
                             num_splits=None,
                             max_block_bytes: int = 4 * 1024 * 1024):
    """Pallas equivalent of the per-hook computation.

    router_logits: [..., num_experts]; flattened to [T, E] like `.view(-1, E)`.
    Returns (cosine_matrix [E, E] f32, l2_matrix [E, E] f32).
    """
    E = router_logits.shape[-1]
    x = router_logits.reshape(-1, E)
    T = x.shape[0]
    if T == 0:   # empty token stream -> eps-clamped zeros, matching the torch hook
        z = jnp.zeros((E, E), jnp.float32)
        return z, z

    itemsize = jnp.dtype(x.dtype).itemsize
    sub_min = 8 if itemsize >= 4 else (16 if itemsize == 2 else 32)

    # Lane-dense repack: [T, E] -> [T*E/128, 128] is a FREE row-major reshape
    # (no HBM copy) whenever E | 128 and T % (128 // E) == 0.  The kernel then
    # streams full 128-lane rows (unmasked vld, 512B DMA runs); the packed
    # Gram's group-diagonal (E, E) blocks are folded back in the finalize.
    group = (128 // E) if (128 % E == 0) else 0
    if group and T % group == 0 and (T // group) >= sub_min:
        C = 128
        R = T // group            # == T * E / 128 packed rows
        xp = x.reshape(R, C)
    else:
        # Copy-free fallback (ragged T or E does not divide 128): lane-sparse
        # [T, E] blocks.  Still avoids the ~3x HBM traffic of a padded copy.
        C, R, xp = E, T, x

    # Tile sizing: as big as possible (amortize ~0.35us/grid-step overhead),
    # capped so each double-buffered input block stays a few MiB -- comfortably
    # inside the 32 MiB scoped-VMEM default on every generation, including
    # v7x's 64 MiB physical VMEM, so no vmem_limit_bytes override is needed.
    cap_rows = max(sub_min,
                   (int(max_block_bytes) // (C * itemsize)) // sub_min * sub_min)
    tile = max(sub_min, min(_round_up(int(tile_rows), sub_min), cap_rows))
    tile = min(tile, R)   # a block never exceeds the array (full-dim blocks are legal)

    # Token-stream split across TensorCores: only worth it on 2-TC chips (v7x);
    # on v5e/v6e a leading "parallel" axis is just a serial outer loop.
    splits = _default_num_splits() if num_splits is None else int(num_splits)
    if splits > 1 and R % splits == 0 and (R // splits) >= sub_min:
        tile = min(tile, R // splits)
    else:
        splits = 1

    out_shape = (jax.ShapeDtypeStruct((E, E), jnp.float32),
                 jax.ShapeDtypeStruct((E, E), jnp.float32))
    cost = pl.CostEstimate(flops=2 * R * C * C, transcendentals=0,
                           bytes_accessed=R * C * itemsize + 2 * E * E * 4)

    if splits == 1:
        # Single fused kernel: Gram accumulation + cosine/L2 finalize on the
        # last grid step (one dispatch, no (C, C) HBM round trip).
        return pl.pallas_call(
            _make_fused_kernel(E, C, R, tile),
            out_shape=out_shape,
            grid=(pl.cdiv(R, tile),),
            in_specs=[pl.BlockSpec((tile, C), lambda t: (t, 0))],
            out_specs=(pl.BlockSpec((E, E), lambda t: (0, 0)),
                       pl.BlockSpec((E, E), lambda t: (0, 0))),
            scratch_shapes=[pltpu.VMEM((C, C), jnp.float32)],
            compiler_params=pltpu.CompilerParams(
                dimension_semantics=("arbitrary",)),
            cost_estimate=cost,
        )(xp)

    # splits > 1 (v7x): each TensorCore streams a contiguous slice of the packed
    # token rows into its own partial Gram; a tiny second kernel combines them.
    # TODO(synk): swap "parallel" for pltpu.CORE_PARALLEL once verified on v7x;
    # plain "parallel" lowers on every generation.
    rows_per_split = R // splits
    x3 = xp.reshape(splits, rows_per_split, C)          # free (contiguous)
    partial = pl.pallas_call(
        _make_partial_gram_kernel(rows_per_split, tile),
        out_shape=jax.ShapeDtypeStruct((splits, C, C), jnp.float32),
        grid=(splits, pl.cdiv(rows_per_split, tile)),
        in_specs=[pl.BlockSpec((None, tile, C), lambda s, t: (s, t, 0))],
        out_specs=pl.BlockSpec((None, C, C), lambda s, t: (s, 0, 0)),
        compiler_params=pltpu.CompilerParams(
            dimension_semantics=("parallel", "arbitrary")),
        cost_estimate=cost,
    )(x3)
    return pl.pallas_call(
        _make_finalize_kernel(E, C),
        out_shape=out_shape,
    )(partial)


class OlmoeRouterLogitsSimilarityTracker:
    """Plain-Python port of the wrapper's running-average bookkeeping.

    (Forward-hook registration / named_modules traversal is host-side torch
    glue; here the caller feeds each MoE block's router_logits explicitly.)
    """

    def __init__(self):
        self.router_logits_similarity_sum = {}
        self.router_logits_similarity_count = {}

    def update(self, layer_name: str, router_logits: jax.Array):
        cos, l2 = router_logits_similarity(router_logits)
        if layer_name not in self.router_logits_similarity_sum:
            self.router_logits_similarity_sum[layer_name] = {"cosine": cos, "l2": l2}
            self.router_logits_similarity_count[layer_name] = 1
        else:
            s = self.router_logits_similarity_sum[layer_name]
            s["cosine"] = s["cosine"] + cos
            s["l2"] = s["l2"] + l2
            self.router_logits_similarity_count[layer_name] += 1

    def compute_router_logits_similarity(self):
        out = {}
        for layer, s in self.router_logits_similarity_sum.items():
            c = self.router_logits_similarity_count[layer]
            # Torch version calls .tolist(); arrays are returned here instead.
            out[layer] = {"cosine": s["cosine"] / c, "l2": s["l2"] / c}
        return out

    def reset_counts(self):
        self.router_logits_similarity_sum = {}
        self.router_logits_similarity_count = {}


def _reference(router_logits):
    E = router_logits.shape[-1]
    x = router_logits.reshape(-1, E).astype(jnp.float32)
    g = jnp.dot(x.T, x, precision=lax.Precision.HIGHEST)
    diag = jnp.diagonal(g)[:, None]
    norms = jnp.sqrt(diag)
    cos = g / jnp.maximum(norms * norms.T, 1e-8)
    l2 = jnp.sqrt(jnp.maximum(diag + diag.T - 2.0 * g, 0.0))
    return cos, l2


def _check(tag, got, ref, atol=2e-3, rtol=2e-3):
    cos, l2 = jax.block_until_ready(got)
    ref_cos, ref_l2 = ref
    assert jnp.allclose(cos, ref_cos, atol=atol, rtol=rtol), f"cosine mismatch ({tag})"
    assert jnp.allclose(l2, ref_l2, atol=atol, rtol=rtol), f"l2 mismatch ({tag})"


if __name__ == "__main__":
    key = jax.random.PRNGKey(0)
    k1, k2, k3 = jax.random.split(key, 3)

    # --- Small shape matching the module's hook: batch=2, seq=8, num_experts=8.
    batch, seq, num_experts = 2, 8, 8
    small = jax.random.normal(k1, (batch, seq, num_experts), dtype=jnp.float32)

    tracker = OlmoeRouterLogitsSimilarityTracker()
    tracker.update("model.layers.0.mlp", small)
    tracker.update("model.layers.0.mlp", small)      # running-average path
    sims = tracker.compute_router_logits_similarity()
    _check("small/tracker",
           (sims["model.layers.0.mlp"]["cosine"], sims["model.layers.0.mlp"]["l2"]),
           _reference(small))

    # --- Realistic OLMoE-ish case: 4100 tokens, 64 experts.
    T_big, E_big = 4100, 64
    big = jax.random.normal(k2, (T_big, E_big), dtype=jnp.float32)
    ref_big = _reference(big)

    # (a) lane-dense packed path, single large tile (default params).
    _check("big/default", router_logits_similarity(big), ref_big)
    # (b) packed path with multi-tile accumulation + masked partial last block.
    _check("big/multitile", router_logits_similarity(big, tile_rows=256), ref_big)
    # (c) 2-way token-stream split (v7x-style path: partial Grams + finalize).
    _check("big/splits2",
           router_logits_similarity(big, tile_rows=512, num_splits=2), ref_big)

    # --- Ragged token count (odd T): copy-free lane-sparse fallback, multi-tile.
    T_odd = 4101
    odd = jax.random.normal(k3, (T_odd, E_big), dtype=jnp.float32)
    _check("odd/fallback", router_logits_similarity(odd, tile_rows=512),
           _reference(odd))

    print("KERNEL_OK")
</pallas_src>

<mosaic_0001>
module attributes {stable_mosaic.version = 11 : i64} {
  func.func @kernel(%arg0: i32, %arg1: memref<16x8xf32, #tpu.memory_space<vmem>>, %arg2: memref<8x8xf32, #tpu.memory_space<vmem>>, %arg3: memref<8x8xf32, #tpu.memory_space<vmem>>, %arg4: memref<8x8xf32, #tpu.memory_space<vmem>>) attributes {dimension_semantics = [#tpu.dimension_semantics<arbitrary>], iteration_bounds = array<i64: 1>, scalar_prefetch = 0 : i64, scratch_operands = 1 : i64, tpu.core_type = #tpu.core_type<tc>, window_params = [{transform_indices = @transform_0, window_bounds = array<i64: 16, 8>}, {pipeline_mode = #tpu.pipeline_mode<synchronous>, transform_indices = @transform_1, window_bounds = array<i64: 8, 8>}, {pipeline_mode = #tpu.pipeline_mode<synchronous>, transform_indices = @transform_2, window_bounds = array<i64: 8, 8>}]} {
    %c0_i32 = arith.constant 0 : i32
    %0 = arith.cmpi eq, %arg0, %c0_i32 : i32
    %1 = arith.extui %0 : i1 to i32
    %c0_i32_0 = arith.constant 0 : i32
    %2 = arith.cmpi ne, %1, %c0_i32_0 : i32
    scf.if %2 {
      %cst_8 = arith.constant 0.000000e+00 : f32
      %11 = vector.broadcast %cst_8 : f32 to vector<8x8xf32>
      %c0_9 = arith.constant 0 : index
      %c0_10 = arith.constant 0 : index
      %12 = vector.load %arg4[%c0_9, %c0_10] : memref<8x8xf32, #tpu.memory_space<vmem>>, vector<8x8xf32>
      tpu.vector_store %arg4[%c0_9, %c0_10], %11 {strides = array<i32>} : memref<8x8xf32, #tpu.memory_space<vmem>>, vector<8x8xf32>,
    } else {
    }
    %c0 = arith.constant 0 : index
    %c0_1 = arith.constant 0 : index
    %3 = vector.load %arg1[%c0, %c0_1] : memref<16x8xf32, #tpu.memory_space<vmem>>, vector<16x8xf32>
    %c0_2 = arith.constant 0 : index
    %c0_3 = arith.constant 0 : index
    %4 = vector.load %arg4[%c0_2, %c0_3] : memref<8x8xf32, #tpu.memory_space<vmem>>, vector<8x8xf32>
    %cst = arith.constant dense<0.000000e+00> : vector<8x8xf32>
    %5 = tpu.matmul %3, %3, %cst {dimension_numbers = #tpu.dot_dimension_numbers<[0], [0], [1], [1], [0, 1, 1, 1], [], []>} : vector<16x8xf32>, vector<16x8xf32>, vector<8x8xf32> -> vector<8x8xf32>
    %6 = arith.addf %4, %5 : vector<8x8xf32>
    %c0_4 = arith.constant 0 : index
    %c0_5 = arith.constant 0 : index
    %7 = vector.load %arg4[%c0_4, %c0_5] : memref<8x8xf32, #tpu.memory_space<vmem>>, vector<8x8xf32>
    tpu.vector_store %arg4[%c0_4, %c0_5], %6 {strides = array<i32>} : memref<8x8xf32, #tpu.memory_space<vmem>>, vector<8x8xf32>,
    %c0_i32_6 = arith.constant 0 : i32
    %8 = arith.cmpi eq, %arg0, %c0_i32_6 : i32
    %9 = arith.extui %8 : i1 to i32
    %c0_i32_7 = arith.constant 0 : i32
    %10 = arith.cmpi ne, %9, %c0_i32_7 : i32
    scf.if %10 {
      %c0_8 = arith.constant 0 : index
      %c0_9 = arith.constant 0 : index
      %11 = vector.load %arg4[%c0_8, %c0_9] : memref<8x8xf32, #tpu.memory_space<vmem>>, vector<8x8xf32>
      %12 = tpu.iota {dimensions = array<i32: 0>} : vector<8x8xi32>
      %13 = tpu.iota {dimensions = array<i32: 1>} : vector<8x8xi32>
      %14 = arith.cmpi eq, %12, %13 : vector<8x8xi32>
      %cst_10 = arith.constant 0.000000e+00 : f32
      %15 = vector.broadcast %cst_10 : f32 to vector<8x8xf32>
      %16 = arith.select %14, %11, %15 : vector<8x8xi1>, vector<8x8xf32>
      %cst_11 = arith.constant dense<0.000000e+00> : vector<8xf32>
      %17 = vector.multi_reduction <add>, %16, %cst_11 [1] : vector<8x8xf32> to vector<8xf32>
      %18 = vector.shape_cast %17 : vector<8xf32> to vector<8x1xf32>
      %cst_12 = arith.constant dense<0.000000e+00> : vector<8xf32>
      %19 = vector.multi_reduction <add>, %16, %cst_12 [0] : vector<8x8xf32> to vector<8xf32>
      %20 = vector.shape_cast %19 : vector<8xf32> to vector<1x8xf32>
      %cst_13 = arith.constant 0.000000e+00 : f32
      %21 = vector.broadcast %cst_13 : f32 to vector<8x1xf32>
      %22 = arith.maximumf %18, %21 : vector<8x1xf32>
      %23 = math.sqrt %22 : vector<8x1xf32>
      %cst_14 = arith.constant 0.000000e+00 : f32
      %24 = vector.broadcast %cst_14 : f32 to vector<1x8xf32>
      %25 = arith.maximumf %20, %24 : vector<1x8xf32>
      %26 = math.sqrt %25 : vector<1x8xf32>
      %27 = vector.broadcast %23 : vector<8x1xf32> to vector<8x8xf32>
      %28 = vector.broadcast %26 : vector<1x8xf32> to vector<8x8xf32>
      %29 = arith.mulf %27, %28 : vector<8x8xf32>
      %cst_15 = arith.constant 9.99999993E-9 : f32
      %30 = vector.broadcast %cst_15 : f32 to vector<8x8xf32>
      %31 = arith.maximumf %29, %30 : vector<8x8xf32>
      %32 = arith.divf %11, %31 : vector<8x8xf32>
      %33 = vector.broadcast %18 : vector<8x1xf32> to vector<8x8xf32>
      %34 = vector.broadcast %20 : vector<1x8xf32> to vector<8x8xf32>
      %35 = arith.addf %33, %34 : vector<8x8xf32>
      %cst_16 = arith.constant 2.000000e+00 : f32
      %36 = vector.broadcast %cst_16 : f32 to vector<8x8xf32>
      %37 = arith.mulf %36, %11 : vector<8x8xf32>
      %38 = arith.subf %35, %37 : vector<8x8xf32>
      %cst_17 = arith.constant 0.000000e+00 : f32
      %39 = vector.broadcast %cst_17 : f32 to vector<8x8xf32>
      %40 = arith.maximumf %38, %39 : vector<8x8xf32>
      %41 = math.sqrt %40 : vector<8x8xf32>
      %c0_18 = arith.constant 0 : index
      %c0_19 = arith.constant 0 : index
      %42 = vector.load %arg2[%c0_18, %c0_19] : memref<8x8xf32, #tpu.memory_space<vmem>>, vector<8x8xf32>
      tpu.vector_store %arg2[%c0_18, %c0_19], %32 {strides = array<i32>} : memref<8x8xf32, #tpu.memory_space<vmem>>, vector<8x8xf32>,
      %c0_20 = arith.constant 0 : index
      %c0_21 = arith.constant 0 : index
      %43 = vector.load %arg3[%c0_20, %c0_21] : memref<8x8xf32, #tpu.memory_space<vmem>>, vector<8x8xf32>
      tpu.vector_store %arg3[%c0_20, %c0_21], %41 {strides = array<i32>} : memref<8x8xf32, #tpu.memory_space<vmem>>, vector<8x8xf32>,
    } else {
    }
    return
  }
  func.func @transform_0(%arg0: i32) -> (i32, i32) {
    %c0_i32 = arith.constant 0 : i32
    %c0_i32_0 = arith.constant 0 : i32
    return %arg0, %c0_i32 : i32, i32
  }
  func.func @transform_1(%arg0: i32) -> (i32, i32) {
    %c0_i32 = arith.constant 0 : i32
    %c0_i32_0 = arith.constant 0 : i32
    %c0_i32_1 = arith.constant 0 : i32
    return %c0_i32, %c0_i32_0 : i32, i32
  }
  func.func @transform_2(%arg0: i32) -> (i32, i32) {
    %c0_i32 = arith.constant 0 : i32
    %c0_i32_0 = arith.constant 0 : i32
    %c0_i32_1 = arith.constant 0 : i32
    return %c0_i32, %c0_i32_0 : i32, i32
  }
}

</mosaic_0001>

<bundles_post_ra>
// kernel: tpu_custom_call.1
= control target key start
LH: loop header
LB: loop body
LE: loop exit
PB: predicated region body
PF: predicated region fallthrough
CT: control target
= control target key end

     0   :  { %8 = vsyncpa [#allocation4], 0  ;;  %s296_s0 = inlined_call_operand.vmem [shape: f32[16,8], index: 0, kind: input, shape index: {}]   ;;  %s297_s1 = inlined_call_operand.hbm [shape: f32[8,8], index: 1, kind: output, shape index: {0}]   ;;  %s298_s2 = inlined_call_operand.hbm [shape: f32[8,8], index: 2, kind: output, shape index: {1}]  }
   0x1   :  { %v18_v0 = vld [vmem:[%s296_s0] sm:$0xff]  ;;  %v19_v1 = vld [vmem:[%s296_s0 + $0x8] sm:$0xff] }
   0x2   :  { %9 = vsyncpa [#allocation6], 0  ;;  %21 = vxpose.xlu0.b32.start [1/2] (short) (narrow) %v18_v0, 8  ;;  %71 = vmatpush.msra.mxu0 %v19_v1  ;;  %vm16_vm0 = vcmask 64512   ;;  %v256_v2 = vmov 0.0   ;;  %vm53_vm1 = vcmask 130048   ;;  %v84_v6 = vlaneseq }
   0x3   :  { %17 = vst.msk [vmem:[#allocation2] sm:$0xff] %vm16_vm0, %v256_v2  ;;  %s257_s0 = smov [#allocation5]   ;;  %s178_s16 = sshll.u32 %s298_s2, 4  ;;  %s179_s16 = int_to_ptr.hbm [resolvable:$true] %s178_s16 }
   0x4   :  { %72 = vmatpush.msra.mxu0 %v18_v0  ;;  %v85_v8 = vshrl.u32 %v84_v6, 7  ;;  %v87_v9 = vand.u32 127, %v84_v6  ;;  %s176_s13 = sshll.u32 %s257_s0, 4  ;;  %s258_s2 = smov [#allocation3]   ;;  %s177_s13 = int_to_ptr.vmem [resolvable:$true] %s176_s13 }
   0x5   :  { %s165_s17 = sshll.u32 %s258_s2, 4  ;;  %s167_s20 = sshll.u32 %s297_s1, 4  ;;  %s166_s17 = int_to_ptr.vmem [resolvable:$true] %s165_s17  ;;  %s168_s20 = int_to_ptr.hbm [resolvable:$true] %s167_s20 }
   0x6   :  { %vm88_vm2 = vcmp.eq.s32.totalorder %v85_v8, %v87_v9 }
   0xa   :  { %22 = vxpose.xlu0.b32.end [2/2] (short) (narrow) %v19_v1, 8  ;;  %v20_v4 = vld [vmem:[#allocation2] sm:$0xff] }
  0xa6   :  { %v37_v3 = vpop.trf.xlu0 }
  0xa7   :  { %192 = vmatmul.msk.f32.vlgmr.msra.gmra.mxu0 %vm53_vm1, %v37_v3 }
 0x124   :  { %v74_v5 = vpop.f32.mrf.mxu0 }
 0x125   :  { %v77_v7 = vadd.f32 %v74_v5, %v20_v4 }
 0x127   :  { %79 = vst.msk [vmem:[#allocation2] sm:$0xff] %vm16_vm0, %v77_v7 }
 0x12e   :  { %v282_v10 = vld [vmem:[#allocation2] sm:$0xff] }
 0x12f   :  { %v89_v11 = vsel %vm88_vm2, %v282_v10, 0.0  ;;  %v143_v24 = vmul.f32 2.0, %v282_v10 }
 0x130   :  { %v90_v12 = vsel %vm16_vm0, %v89_v11, 0.0 }
 0x131   :  { %91 = vadd.xlane.f32.xlu1 %v90_v12  ;;  %v93_v13 = vrot.slane %v90_v12, 4 }
 0x133   :  { %v94_v14 = vadd.f32 %v93_v13, %v90_v12 }
 0x135   :  { %v95_v15 = vrot.slane %v94_v14, 2 }
 0x137   :  { %v96_v16 = vadd.f32 %v95_v15, %v94_v14 }
 0x139   :  { %v97_v17 = vrot.slane %v96_v16, 1 }
 0x13b   :  { %v98_v18 = vadd.f32 %v97_v17, %v96_v16 }
 0x13d   :  { %v112_v19 = vmax.f32 %v98_v18, 0.0 }
 0x13f   :  { %196 = vrsqrt.f32 %v112_v19  ;;  %vm120_vm3 = vcmp.eq.f32.partialorder %v112_v19, inf  ;;  %v123_v47 = vand.u32 2147483648, %v112_v19  ;;  %vm122_vm6 = vcmp.eq.f32.partialorder %v112_v19, 0.0 }
 0x145   :  { %v197_v20 = vpop.eup %196 }
 0x146   :  { %v114_v21 = vmul.f32 %v197_v20, %v112_v19 }
 0x148   :  { %v115_v23 = vmul.f32 %v197_v20, %v114_v21 }
 0x14a   :  { %v116_v28 = vmul.f32 0.5, %v115_v23 }
 0x14c   :  { %v117_v30 = vsub.f32 1.5, %v116_v28 }
 0x14e   :  { %v118_v34 = vmul.f32 %v197_v20, %v117_v30 }
 0x150   :  { %v119_v39 = vmul.f32 %v118_v34, %v112_v19 }
 0x152   :  { %v121_v44 = vsel %vm120_vm3, %v112_v19, %v119_v39 }
 0x153   :  { %v124_v51 = vsel %vm122_vm6, %v123_v47, %v121_v44 }
 0x1a4   :  { %v92_v22 = vpop.xlane.xlu1 %91 }
 0x1a5   :  { %v99_v25 = vmax.f32 %v92_v22, 0.0  ;;  %v142_v26 = vadd.f32 %v98_v18, %v92_v22 }
 0x1a7   :  { %198 = vrsqrt.f32 %v99_v25  ;;  %v144_v27 = vsub.f32 %v142_v26, %v143_v24  ;;  %vm107_vm4 = vcmp.eq.f32.partialorder %v99_v25, inf  ;;  %v110_v46 = vand.u32 2147483648, %v99_v25 }
 0x1a8   :  { %vm109_vm5 = vcmp.eq.f32.partialorder %v99_v25, 0.0 }
 0x1a9   :  { %v145_v29 = vmax.f32 %v144_v27, 0.0 }
 0x1ab   :  { %200 = vrsqrt.f32 %v145_v29  ;;  %vm153_vm7 = vcmp.eq.f32.partialorder %v145_v29, inf  ;;  %v156_v54 = vand.u32 2147483648, %v145_v29  ;;  %vm155_vm8 = vcmp.eq.f32.partialorder %v145_v29, 0.0 }
 0x1ad   :  { %v199_v31 = vpop.eup %198 }
 0x1ae   :  { %v101_v32 = vmul.f32 %v199_v31, %v99_v25 }
 0x1b0   :  { %v102_v33 = vmul.f32 %v199_v31, %v101_v32 }
 0x1b1   :  { %v201_v35 = vpop.eup %200 }
 0x1b2   :  { %v103_v36 = vmul.f32 0.5, %v102_v33  ;;  %v147_v37 = vmul.f32 %v201_v35, %v145_v29 }
 0x1b4   :  { %v104_v38 = vsub.f32 1.5, %v103_v36  ;;  %v148_v40 = vmul.f32 %v201_v35, %v147_v37 }
 0x1b6   :  { %v105_v41 = vmul.f32 %v199_v31, %v104_v38  ;;  %v149_v42 = vmul.f32 0.5, %v148_v40 }
 0x1b8   :  { %v106_v43 = vmul.f32 %v105_v41, %v99_v25  ;;  %v150_v45 = vsub.f32 1.5, %v149_v42 }
 0x1ba   :  { %v108_v48 = vsel %vm107_vm4, %v99_v25, %v106_v43  ;;  %v151_v49 = vmul.f32 %v201_v35, %v150_v45 }
 0x1bb   :  { %v111_v50 = vsel %vm109_vm5, %v110_v46, %v108_v48 }
 0x1bc   :  { %v125_v52 = vmul.f32 %v124_v51, %v111_v50  ;;  %v152_v53 = vmul.f32 %v151_v49, %v145_v29 }
 0x1be   :  { %v126_v55 = vmax.f32 %v125_v52, 1e-08  ;;  %v154_v56 = vsel %vm153_vm7, %v145_v29, %v152_v53 }
 0x1bf   :  { %v157_v57 = vsel %vm155_vm8, %v156_v54, %v154_v56 }
 0x1c0   :  { %202 = vrcp.f32 %v126_v55  ;;  %159 = vst.msk [vmem:[#allocation5] sm:$0xff] %vm16_vm0, %v157_v57  ;;  %v138_v61 = vand.u32 2147483648, %v126_v55  ;;  %v136_v63 = vand.u32 2147483647, %v126_v55  ;;  %vm132_vm10 = vweird.f32 %v126_v55 }
 0x1c1   :  { %181 = dma.vmem_to_hbm [thread:$0]  %s177_s13, 128, %s179_s16, [#allocation6]  }
 0x1c2   :  { %v139_v1 = vor.u32 1.1754944e-38, %v138_v61  ;;  %vm137_vm12 = vcmp.eq.f32.partialorder %v136_v63, 8.507059e+37 }
 0x1c6   :  { %v203_v58 = vpop.eup %202 }
 0x1c7   :  { %v128_v59 = vmul.f32 %v203_v58, %v126_v55  ;;  %vm133_vm9 = vweird.f32 %v203_v58 }
 0x1c8   :  { %vm134_vm11 = vmor %vm132_vm10, %vm133_vm9 }
 0x1c9   :  { %v129_v60 = vsub.f32 1.0, %v128_v59 }
 0x1cb   :  { %v130_v62 = vmul.f32 %v203_v58, %v129_v60 }
 0x1cd   :  { %v131_v0 = vadd.f32 %v203_v58, %v130_v62 }
 0x1cf   :  { %v135_v2 = vsel %vm134_vm11, %v203_v58, %v131_v0 }
 0x1d0   :  { %v140_v3 = vsel %vm137_vm12, %v139_v1, %v135_v2 }
 0x1d1   :  { %v141_v4 = vmul.f32 %v140_v3, %v282_v10 }
 0x1d3   :  { %158 = vst.msk [vmem:[#allocation3] sm:$0xff] %vm16_vm0, %v141_v4 }
 0x1d4   :  { %170 = dma.vmem_to_hbm [thread:$0]  %s166_s17, 128, %s168_s20, [#allocation4]  }
 0x1d5   :  { %252 = dma.done.wait [#allocation4], 128  }
 0x1d6   :  { %253 = vsyncadd [#allocation4], 4294967168 }
 0x1d7   :  { %254 = dma.done.wait [#allocation6], 128  }
 0x1d8   :  { %255 = vsyncadd [#allocation6], 4294967168 }
 0x1d9   :  { %190 = vsyncpa [#allocation4], 1 }
 0x1da   :  { %191 = vsyncpa [#allocation6], 1 }

</bundles_post_ra>
